<compile_context>
chip_gen: v7x
topology: tpu7x:2x2x1
jax: 0.10.0
libtpu: 0.0.40
codegen_flags: <defaults>
</compile_context>

<pallas_src>
import jax
import jax.numpy as jnp
from jax.experimental import pallas as pl
from jax.experimental.pallas import tpu as pltpu


def _mlp_kernel(x_ref, w1_ref, b1_ref, w2_ref, b2_ref, o_ref):
    # Fused forward of the whole nn.Sequential stack for one batch tile:
    #   h = relu(x @ W1 + b1) ; out = h @ W2 + b2
    # W1/W2 arrive pre-cast to bf16 (MXU-native); x is cast in-kernel.
    # Accumulation and elementwise math stay f32 on the VPU (keeps v5e happy —
    # no bf16 VALU there).
    x = x_ref[...].astype(jnp.bfloat16)                  # (tile_b, D_in)
    h = jnp.dot(x, w1_ref[...], preferred_element_type=jnp.float32) + b1_ref[...]
    h = jnp.maximum(h, 0.0)                              # ReLU in f32 (VPU)
    out = (
        jnp.dot(h.astype(jnp.bfloat16), w2_ref[...],
                preferred_element_type=jnp.float32)
        + b2_ref[...]
    )
    o_ref[...] = out.astype(o_ref.dtype)


def _round_up(x, m):
    return ((x + m - 1) // m) * m


def prepare_params(w1, b1, w2, b2):
    """One-time parameter preparation (module init, NOT per forward call).

    w1: (D_in, H)   pre-transposed Linear weight -> bf16
    b1: (H,)/(1,H)  bias -> f32, shape (1, H)
    w2: (H, D_out)  pre-transposed Linear weight -> bf16
    b2: (D_out,)/(1,D_out) bias -> f32, shape (1, D_out)
    """
    return (
        jnp.asarray(w1, jnp.bfloat16),
        jnp.asarray(b1, jnp.float32).reshape(1, -1),
        jnp.asarray(w2, jnp.bfloat16),
        jnp.asarray(b2, jnp.float32).reshape(1, -1),
    )


def sequential_forward(x, w1_bf16, b1_f32, w2_bf16, b2_f32, *, tile_b=4096):
    """Runs the fused Sequential forward as a single Pallas kernel launch.

    x       : (B, D_in)   float32 (or bf16)
    w1_bf16 : (D_in, H)   bfloat16   (from prepare_params)
    b1_f32  : (1, H)      float32
    w2_bf16 : (H, D_out)  bfloat16
    b2_f32  : (1, D_out)  float32
    returns (B, D_out) float32
    """
    B, D_in = x.shape
    H = w1_bf16.shape[1]
    D_out = w2_bf16.shape[1]

    # Batch tile: multiple of 8 sublanes; clamp to B; additionally ensure the
    # grid has at least 2 steps so v7x can shard the batch axis across its two
    # TensorCores (harmless extra step on v5e/v6e).
    tile_b = max(8, min(int(tile_b), _round_up(B, 8)))
    if B > 8:
        tile_b = min(tile_b, _round_up(pl.cdiv(B, 2), 8))

    grid = (pl.cdiv(B, tile_b),)

    out = pl.pallas_call(
        _mlp_kernel,
        out_shape=jax.ShapeDtypeStruct((B, D_out), jnp.float32),
        grid=grid,
        in_specs=[
            # Activations: tiled over the batch grid axis (ragged last tile OK —
            # rows are independent, OOB output rows are masked on writeback).
            pl.BlockSpec((tile_b, D_in), lambda i: (i, 0)),
            # Weights/biases: constant block index -> resident in VMEM across
            # all grid steps. Blocks equal the full (small) array dims.
            pl.BlockSpec((D_in, H), lambda i: (0, 0)),
            pl.BlockSpec((1, H), lambda i: (0, 0)),
            pl.BlockSpec((H, D_out), lambda i: (0, 0)),
            pl.BlockSpec((1, D_out), lambda i: (0, 0)),
        ],
        out_specs=pl.BlockSpec((tile_b, D_out), lambda i: (i, 0)),
        compiler_params=pltpu.CompilerParams(
            # No cross-step dependency: batch axis is trivially parallel
            # (enables megacore sharding on v7x; no-op on v5e/v6e).
            dimension_semantics=("parallel",),
        ),
    )(x, w1_bf16, b1_f32, w2_bf16, b2_f32)

    return out


def _ref_forward_f32(x, w1, b1, w2, b2):
    h = jnp.maximum(x @ w1 + b1, 0.0)
    return h @ w2 + b2


def _ref_forward_bf16(x, w1, b1, w2, b2):
    # Mirrors the kernel's numerics: bf16 MXU operands, f32 accumulation,
    # f32 elementwise.
    h = jnp.dot(x.astype(jnp.bfloat16), w1.astype(jnp.bfloat16),
                preferred_element_type=jnp.float32) + b1
    h = jnp.maximum(h, 0.0)
    return jnp.dot(h.astype(jnp.bfloat16), w2.astype(jnp.bfloat16),
                   preferred_element_type=jnp.float32) + b2


if __name__ == "__main__":
    # Small shapes consistent with the forward: batch=32, in=32, hidden=64, out=16.
    # The tile_b clamp makes the batch grid 2 steps here (exercises the pipelined
    # grid with resident weights and the v7x >=2-step guarantee).
    B, D_IN, H, D_OUT = 32, 32, 64, 16

    key = jax.random.PRNGKey(0)
    kx, kw1, kb1, kw2, kb2 = jax.random.split(key, 5)

    x = jax.random.normal(kx, (B, D_IN), dtype=jnp.float32)

    # Deterministic parameter init (uniform, PyTorch-Linear-style bounds).
    lim1 = 1.0 / jnp.sqrt(jnp.float32(D_IN))
    lim2 = 1.0 / jnp.sqrt(jnp.float32(H))
    w1 = jax.random.uniform(kw1, (D_IN, H), jnp.float32, -lim1, lim1)
    b1 = jax.random.uniform(kb1, (1, H), jnp.float32, -lim1, lim1)
    w2 = jax.random.uniform(kw2, (H, D_OUT), jnp.float32, -lim2, lim2)
    b2 = jax.random.uniform(kb2, (1, D_OUT), jnp.float32, -lim2, lim2)

    # One-time parameter preparation (would live in module init).
    params = prepare_params(w1, b1, w2, b2)

    out = sequential_forward(x, *params)
    out = jax.block_until_ready(out)
    assert out.shape == (B, D_OUT)
    assert out.dtype == jnp.float32

    # Tight check against a reference with matched (bf16-operand) numerics.
    ref_bf16 = _ref_forward_bf16(x, w1, b1, w2, b2)
    assert jnp.allclose(out, ref_bf16, atol=1e-3, rtol=1e-3), "mismatch vs bf16 reference"

    # Looser sanity check against the full-precision (f32) reference — the
    # original module is float64; bf16 MXU operands bound the error here.
    ref_f32 = _ref_forward_f32(x, w1, b1, w2, b2)
    assert jnp.allclose(out, ref_f32, atol=5e-2, rtol=5e-2), "mismatch vs f32 reference"

    print("KERNEL_OK")
</pallas_src>

<mosaic_0001>
module attributes {stable_mosaic.version = 11 : i64} {
  func.func @_mlp_kernel(%arg0: i32, %arg1: memref<16x32xf32, #tpu.memory_space<vmem>>, %arg2: memref<32x64xbf16, #tpu.memory_space<vmem>>, %arg3: memref<1x64xf32, #tpu.memory_space<vmem>>, %arg4: memref<64x16xbf16, #tpu.memory_space<vmem>>, %arg5: memref<1x16xf32, #tpu.memory_space<vmem>>, %arg6: memref<16x16xf32, #tpu.memory_space<vmem>>) attributes {dimension_semantics = [#tpu.dimension_semantics<parallel>], iteration_bounds = array<i64: 2>, scalar_prefetch = 0 : i64, scratch_operands = 0 : i64, tpu.core_type = #tpu.core_type<tc>, window_params = [{transform_indices = @transform_0, window_bounds = array<i64: 16, 32>}, {pipeline_mode = #tpu.pipeline_mode<synchronous>, transform_indices = @transform_1, window_bounds = array<i64: 32, 64>}, {pipeline_mode = #tpu.pipeline_mode<synchronous>, transform_indices = @transform_2, window_bounds = array<i64: 1, 64>}, {pipeline_mode = #tpu.pipeline_mode<synchronous>, transform_indices = @transform_3, window_bounds = array<i64: 64, 16>}, {pipeline_mode = #tpu.pipeline_mode<synchronous>, transform_indices = @transform_4, window_bounds = array<i64: 1, 16>}, {transform_indices = @transform_5, window_bounds = array<i64: 16, 16>}]} {
    %c0 = arith.constant 0 : index
    %c0_0 = arith.constant 0 : index
    %0 = vector.load %arg1[%c0, %c0_0] : memref<16x32xf32, #tpu.memory_space<vmem>>, vector<16x32xf32>
    %1 = arith.truncf %0 : vector<16x32xf32> to vector<16x32xbf16>
    %c0_1 = arith.constant 0 : index
    %c0_2 = arith.constant 0 : index
    %2 = vector.load %arg2[%c0_1, %c0_2] : memref<32x64xbf16, #tpu.memory_space<vmem>>, vector<32x64xbf16>
    %cst = arith.constant dense<0.000000e+00> : vector<16x64xf32>
    %3 = tpu.matmul %1, %2, %cst {dimension_numbers = #tpu.dot_dimension_numbers<[1], [0], [0], [1], [0, 0, 1, 1], [], []>} : vector<16x32xbf16>, vector<32x64xbf16>, vector<16x64xf32> -> vector<16x64xf32>
    %c0_3 = arith.constant 0 : index
    %c0_4 = arith.constant 0 : index
    %4 = vector.load %arg3[%c0_3, %c0_4] : memref<1x64xf32, #tpu.memory_space<vmem>>, vector<1x64xf32>
    %5 = vector.broadcast %4 : vector<1x64xf32> to vector<16x64xf32>
    %6 = arith.addf %3, %5 : vector<16x64xf32>
    %cst_5 = arith.constant 0.000000e+00 : f32
    %7 = vector.broadcast %cst_5 : f32 to vector<16x64xf32>
    %8 = arith.maximumf %6, %7 : vector<16x64xf32>
    %9 = arith.truncf %8 : vector<16x64xf32> to vector<16x64xbf16>
    %c0_6 = arith.constant 0 : index
    %c0_7 = arith.constant 0 : index
    %10 = vector.load %arg4[%c0_6, %c0_7] : memref<64x16xbf16, #tpu.memory_space<vmem>>, vector<64x16xbf16>
    %cst_8 = arith.constant dense<0.000000e+00> : vector<16x16xf32>
    %11 = tpu.matmul %9, %10, %cst_8 {dimension_numbers = #tpu.dot_dimension_numbers<[1], [0], [0], [1], [0, 0, 1, 1], [], []>} : vector<16x64xbf16>, vector<64x16xbf16>, vector<16x16xf32> -> vector<16x16xf32>
    %c0_9 = arith.constant 0 : index
    %c0_10 = arith.constant 0 : index
    %12 = vector.load %arg5[%c0_9, %c0_10] : memref<1x16xf32, #tpu.memory_space<vmem>>, vector<1x16xf32>
    %13 = vector.broadcast %12 : vector<1x16xf32> to vector<16x16xf32>
    %14 = arith.addf %11, %13 : vector<16x16xf32>
    %c0_11 = arith.constant 0 : index
    %c0_12 = arith.constant 0 : index
    %15 = vector.load %arg6[%c0_11, %c0_12] : memref<16x16xf32, #tpu.memory_space<vmem>>, vector<16x16xf32>
    tpu.vector_store %arg6[%c0_11, %c0_12], %14 {strides = array<i32>} : memref<16x16xf32, #tpu.memory_space<vmem>>, vector<16x16xf32>,
    return
  }
  func.func @transform_0(%arg0: i32) -> (i32, i32) {
    %c0_i32 = arith.constant 0 : i32
    %c0_i32_0 = arith.constant 0 : i32
    return %arg0, %c0_i32 : i32, i32
  }
  func.func @transform_1(%arg0: i32) -> (i32, i32) {
    %c0_i32 = arith.constant 0 : i32
    %c0_i32_0 = arith.constant 0 : i32
    %c0_i32_1 = arith.constant 0 : i32
    return %c0_i32, %c0_i32_0 : i32, i32
  }
  func.func @transform_2(%arg0: i32) -> (i32, i32) {
    %c0_i32 = arith.constant 0 : i32
    %c0_i32_0 = arith.constant 0 : i32
    %c0_i32_1 = arith.constant 0 : i32
    return %c0_i32, %c0_i32_0 : i32, i32
  }
  func.func @transform_3(%arg0: i32) -> (i32, i32) {
    %c0_i32 = arith.constant 0 : i32
    %c0_i32_0 = arith.constant 0 : i32
    %c0_i32_1 = arith.constant 0 : i32
    return %c0_i32, %c0_i32_0 : i32, i32
  }
  func.func @transform_4(%arg0: i32) -> (i32, i32) {
    %c0_i32 = arith.constant 0 : i32
    %c0_i32_0 = arith.constant 0 : i32
    %c0_i32_1 = arith.constant 0 : i32
    return %c0_i32, %c0_i32_0 : i32, i32
  }
  func.func @transform_5(%arg0: i32) -> (i32, i32) {
    %c0_i32 = arith.constant 0 : i32
    %c0_i32_0 = arith.constant 0 : i32
    return %arg0, %c0_i32 : i32, i32
  }
}

</mosaic_0001>

<bundles_post_ra>
// kernel: tpu_custom_call.1
= control target key start
LH: loop header
LB: loop body
LE: loop exit
PB: predicated region body
PF: predicated region fallthrough
CT: control target
= control target key end

     0   :  { %10 = vsyncpa [#allocation3], 0  ;;  %s628_s18 = smov 0   ;;  %s712_s0 = inlined_call_operand.vmem [shape: f32[32,32], index: 0, kind: input, shape index: {}]   ;;  %s713_s1 = inlined_call_operand.hbm [shape: bf16[32,64], index: 1, kind: input, shape index: {}]   ;;  %s714_s2 = inlined_call_operand.vmem [shape: f32[1,64], index: 2, kind: input, shape index: {}]   ;;  %s715_s3 = inlined_call_operand.vmem [shape: bf16[64,16], index: 3, kind: input, shape index: {}]   ;;  %s716_s4 = inlined_call_operand.vmem [shape: f32[1,16], index: 4, kind: input, shape index: {}]   ;;  %s717_s5 = inlined_call_operand.vmem [shape: f32[32,16], index: 5, kind: output, shape index: {}]  }
   0x1 LB: > { %s473_s19 = sadd.s32 4294967295, %s591_s18   ;;  %p475_p0 = scmp.ge.s32.totalorder %s591_s18, 1  ;;  %s591_s18 = sphi %s628_s18, %s16_s18  }
   0x2   : > { %p157_p1 = scmp.lt.s32.totalorder %s591_s18, 3  ;;  %s593_s20 = smov [#allocation2]  }
   0x3   : > { %s169_s21 = sshll.u32 %s593_s20, 4  ;;  %p642_p3 = scmp.eq.s32.totalorder %s473_s19, 0  ;;  %s170_s21 = int_to_ptr.vmem [resolvable:$true] %s169_s21 }
   0x4   : > { %p636_p2 = pnand %p475_p0, %p157_p1  ;;  %s553_s27 = scalar_lea.hbm %s713_s1, 256 }
   0x5   : > { %s722_s23 = scalar_select %p642_p3, 1, 0 }
   0x6   : > { %s721_s22 = scalar_select %p636_p2, 1, 0 }
   0x7   : > { %p528_p4 = pneg %p636_p2  ;;  %p554_p6 = scmp.ne.s32.totalorder %s713_s1, %s553_s27 }
   0x8   : > { %p560_p10 = scmp.lt.u32.totalorder %s553_s27, %s713_s1 }
   0x9   : > { %p650_p5 = pnand %p642_p3, %p528_p4 }
   0xb   : > { %p555_p7 = pneg %p650_p5 }
   0xd   : > { %p556_p8 = pnand %p555_p7, %p554_p6 }
   0xf   : > { %p557_p9 = pneg %p556_p8 }
  0x11   : > { %p562_p11 = pnand %p560_p10, %p557_p9 }
  0x13   : > { %565 = shalt.err (!%p562_p11)
}
  0x14   : > { %s566_s7 = scalar_lea.vmem %s170_s21, 256  ;;  %p574_p1 = scmp.lt.s32.totalorder %s170_s21, %s170_s21 }
  0x15   : > { %p567_p12 = scmp.ne.s32.totalorder %s170_s21, %s566_s7  ;;  %p575_p4 = scmp.lt.s32.totalorder %s566_s7, %s566_s7 }
  0x17   : > { %p569_p13 = pnand %p567_p12, %p555_p7  ;;  %p576_p3 = por %p575_p4, %p574_p1 }
  0x19   : > { %p570_p0 = pneg %p569_p13 }
  0x1b   : > { %p577_p2 = pnand %p576_p3, %p570_p0 }
  0x1d   : > { %580 = shalt.err (!%p577_p2)
}
  0x1e   : > { %s594_s8 = smov 64   ;;  %s595_s9 = smov 4  }
  0x1f   : > { %531 = dma.hbm_to_vmem [thread:$0]  (!%p650_p5), %s713_s1, 256, %s170_s21, [#allocation3], %s594_s8, %s594_s8, %s595_s9  }
  0x20   : > { %p724_p6 = scmp.ne.s32.totalorder %s721_s22, 0 }
  0x21   : > { %p725_p8 = scmp.ne.s32.totalorder (!%p724_p6), %s722_s23, 0 }
  0x22   : > { %203 = sbr.rel (%p724_p6) target bundleno = 489 (0x1e9), region = 40 }
  0x29   : > { %586 = dma.done.wait (%p725_p8), [#allocation3], 256  }
  0x2a   : > { %588 = vsyncadd (%p725_p8), [#allocation3], 4294967040  ;;  %s480_s12 = sshll.u32 %s473_s19, 1  ;;  %v596_v0 = vmov 0.0   ;;  %vm597_vm0 = vmmov 0   ;;  %v547_v1 = vld [vmem:[#allocation2] sm:$0xff]  }
  0x2b   : > { %504 = vmatprep.subr.bf16.mxu0 %v596_v0  ;;  %508 = vmatprep.mubr.msk.bf16.mxu0 %vm597_vm0, %v596_v0  ;;  %p232_p2 = scmp.lt.s32.totalorder %s480_s12, 3  ;;  %v548_v2 = vld [vmem:[#allocation2 + $0x8] sm:$0xff]   ;;  %v549_v5 = vld [vmem:[%s715_s3] sm:$0xff]   ;;  %vm270_vm1 = vcmask 261120   ;;  %v551_v8 = vld [vmem:[%s715_s3 + $0x10] sm:$0xff]   ;;  %vm357_vm2 = vcmask 523264  }
  0x2c   : > { %512 = vmatprep.subr.bf16.mxu1 %v596_v0  ;;  %520 = vmatprep.mubr.msk.bf16.mxu1 %vm597_vm0, %v596_v0  ;;  %v550_v6 = vld [vmem:[%s715_s3 + $0x8] sm:$0xff]   ;;  %v552_v9 = vld [vmem:[%s715_s3 + $0x18] sm:$0xff]   ;;  %v484_v10 = vld [vmem:[%s714_s2] ss:$0 sm:$0xff]  ;;  %vm402_vm3 = vcmask 130048  }
  0x2d   : > { %s727_s12 = smov (!%p232_p2, %s480_s12), 3  ;;  %505 = vmatpush3.bf16.msra.mxu0 %v547_v1  ;;  %513 = vmatpush3.bf16.msra.mxu1 %v549_v5  ;;  %v488_v20 = vld [vmem:[%s716_s4] ss:$0 sm:$0xff] }
  0x2e   : > { %s481_s13 = sshll.u32 %s727_s12, 3  ;;  %506 = vmatprep.subr.bf16.mxu0 %v596_v0  ;;  %514 = vmatprep.subr.bf16.mxu1 %v596_v0 }
  0x2f   : > { %s235_s16 = scalar_lea.vmem %s712_s0, %s481_s13  ;;  %s241_s7 = scalar_lea.vmem %s717_s5, %s481_s13 }
  0x30   : > { %v244_v3 = vld [vmem:[%s235_s16] sm:$0xff]  ;;  %v245_v4 = vld [vmem:[%s235_s16 + $0x8] sm:$0xff] }
  0x31   : > { %v246_v7 = vpack.c.bf16 %v245_v4, %v244_v3  ;;  %507 = vmatpush3.bf16.msra.mxu0 %v548_v2  ;;  %515 = vmatpush3.bf16.msra.mxu1 %v550_v6 }
  0x32   : > { %516 = vmatprep.subr.bf16.mxu1 %v596_v0 }
  0x34   : > { %509 = vmatmul.mubr.msk.bf16.vlgmr.msra.gmra.mrb[0].mxu0 %vm270_vm1, %v246_v7 }
  0x35   : > { %517 = vmatpush3.bf16.msra.mxu1 %v551_v8 }
  0x36   : > { %518 = vmatprep.subr.bf16.mxu1 %v596_v0 }
  0x39   : > { %519 = vmatpush3.bf16.msra.mxu1 %v552_v9 }
 0x107   : > { %v308_v11 = vpop.f32.mrb[0].mxu0 }
 0x108   : > { %v309_v12 = vadd.f32 %v484_v10, %v308_v11  ;;  %v510_v13 = vpop.f32.mrb[1].mxu0 }
 0x109   : > { %v311_v14 = vpop.f32.mrb[2].mxu0 }
 0x10a   : > { %v312_v15 = vadd.f32 %v484_v10, %v311_v14  ;;  %v511_v16 = vpop.f32.mrb[3].mxu0  ;;  %v315_v17 = vmax.f32 %v309_v12, 0.0 }
 0x10c   : > { %v316_v18 = vmax.f32 %v312_v15, 0.0 }
 0x10e   : > { %v317_v19 = vpack.c.bf16 %v316_v18, %v315_v17 }
 0x110   : > { %521 = vmatmul.mubr.msk.bf16.vlgmr.msra.gmra.mrb[0].mxu1 %vm357_vm2, %v317_v19 }
 0x1e3   : > { %v395_v21 = vpop.f32.mrb[0].mxu1 }
 0x1e4   : > { %v396_v22 = vadd.f32 %v488_v20, %v395_v21  ;;  %v522_v23 = vpop.f32.mrb[1].mxu1 }
 0x1e5   : > { %v398_v24 = vpop.f32.mrb[2].mxu1 }
 0x1e6   : > { %403 = vst.msk [vmem:[%s241_s7] sm:$0xff] %vm402_vm3, %v396_v22  ;;  %v399_v25 = vadd.f32 %v488_v20, %v398_v24  ;;  %v523_v26 = vpop.f32.mrb[3].mxu1 }
 0x1e8   : > { %404 = vst.msk [vmem:[%s241_s7 + $0x8] sm:$0xff] %vm402_vm3, %v399_v25 }
 0x1e9 PF: > { %s16_s18 = sadd.s32 1, %s591_s18  }
 0x1ea   : > { %p13_p3 = scmp.ge.s32.totalorder %s16_s18, 4  }
 0x1ec   :  { %15 = sbr.rel (!%p13_p3) target bundleno = 1 (0x1), region = 75 }
 0x1f3   :  { %427 = vsyncpa [#allocation3], 1 }
 0x1f4   :  { %429 = vsyncpa [#allocation3 + $0x1], 1 }

</bundles_post_ra>
